<compile_context>
chip_gen: v7x
topology: tpu7x:2x2x1
jax: 0.10.0
libtpu: 0.0.40
codegen_flags: <defaults>
</compile_context>

<pallas_src>
import jax
import jax.numpy as jnp
from jax.experimental import pallas as pl
from jax.experimental.pallas import tpu as pltpu


def _make_mlp_kernel(h):
    """Kernel closed over the (static) hidden width H."""

    def kernel(params_ref, x_ref, o_ref):
        # params_ref: SMEM f32[3*H + 1] = [w1_0..w1_{H-1}, b1_0.., w2_0.., b2]
        # x_ref:      VMEM f32[TR, 128]  (batch elements, dense on sublane+lane)
        # o_ref:      VMEM f32[TR, 128]
        x = x_ref[...]
        acc = jnp.zeros(x.shape, dtype=jnp.float32)
        # Statically unrolled accumulation over hidden units (pure VPU work:
        # scalar-broadcast FMA + max + FMA per unit; no MXU, no XLU reduce).
        for j in range(h):
            w1j = params_ref[j]
            b1j = params_ref[h + j]
            w2j = params_ref[2 * h + j]
            acc = acc + w2j * jnp.maximum(w1j * x + b1j, 0.0)
        o_ref[...] = (acc + params_ref[3 * h]).astype(o_ref.dtype)

    return kernel


def red_neuronal_forward(x, w1, b1, w2, b2, *, max_rows_per_tile=256):
    """Forward pass of RedNeuronal as a single fused Pallas kernel.

    PyTorch-layout parameters:
      x:  (N, 1)  float32
      w1: (H, 1)  capa_oculta.weight
      b1: (H,)    capa_oculta.bias
      w2: (1, H)  capa_salida.weight
      b2: (1,)    capa_salida.bias
    returns (N, 1) float32
    """
    n = x.shape[0]
    h = w1.shape[0]

    # Batch -> dense (rows, 128) layout. Rows padded to a multiple of 8.
    n_rows = -(-n // 128)                       # ceil(n / 128)
    n_rows = max(8, ((n_rows + 7) // 8) * 8)

    tr = min(max_rows_per_tile, n_rows)
    tr = max(8, (tr // 8) * 8)                  # keep TR a multiple of 8
    # v7x megacore: once there's a reasonable amount of work, make sure the
    # "parallel" grid has at least 2 steps so both TensorCores participate.
    if n_rows // tr < 2 and n_rows >= 16:
        tr = ((n_rows + 15) // 16) * 8          # ~half the rows, multiple of 8

    n_rows_pad = ((n_rows + tr - 1) // tr) * tr
    n_pad = n_rows_pad * 128
    grid = (n_rows_pad // tr,)

    # TODO(synk): for very large N the tail-only pad below and the output
    # slice are extra HBM passes; an in-kernel ragged-tail mask would remove
    # them. They are exact no-ops whenever N is already a tile multiple.
    x_tiles = jnp.pad(x.reshape(n).astype(jnp.float32),
                      (0, n_pad - n)).reshape(n_rows_pad, 128)

    # Pack all parameters into a single 1-D SMEM array (one buffer, ~512 B).
    params = jnp.concatenate([
        w1.reshape(h).astype(jnp.float32),
        b1.reshape(h).astype(jnp.float32),
        w2.reshape(h).astype(jnp.float32),
        b2.reshape(1).astype(jnp.float32),
    ])                                           # (3*H + 1,)

    out = pl.pallas_call(
        _make_mlp_kernel(h),
        out_shape=jax.ShapeDtypeStruct((n_rows_pad, 128), jnp.float32),
        grid=grid,
        in_specs=[
            pl.BlockSpec(memory_space=pltpu.MemorySpace.SMEM),  # packed params
            pl.BlockSpec((tr, 128), lambda i: (i, 0)),          # x batch tile
        ],
        out_specs=pl.BlockSpec((tr, 128), lambda i: (i, 0)),    # lane-dense out
        compiler_params=pltpu.CompilerParams(
            dimension_semantics=("parallel",),   # v7x: 2 TCs split the batch
            vmem_limit_bytes=32 * 1024 * 1024,   # safe on v5e/v6e/v7x
        ),
    )(params, x_tiles)

    return out.reshape(n_pad)[:n].reshape(n, 1)


def init_params(key, num_neuronas_ocultas):
    """PyTorch nn.Linear default init (uniform +/- 1/sqrt(fan_in)), PyTorch layout."""
    k1, k2, k3, k4 = jax.random.split(key, 4)
    h = num_neuronas_ocultas
    bound1 = 1.0                      # capa_oculta: Linear(1, h), fan_in = 1
    w1 = jax.random.uniform(k1, (h, 1), jnp.float32, -bound1, bound1)
    b1 = jax.random.uniform(k2, (h,), jnp.float32, -bound1, bound1)
    bound2 = 1.0 / jnp.sqrt(h)        # capa_salida: Linear(h, 1), fan_in = h
    w2 = jax.random.uniform(k3, (1, h), jnp.float32, -bound2, bound2)
    b2 = jax.random.uniform(k4, (1,), jnp.float32, -bound2, bound2)
    return w1, b1, w2, b2


def _reference(x, w1, b1, w2, b2):
    # PyTorch semantics: relu(x @ W1^T + b1) @ W2^T + b2
    return jnp.maximum(x @ w1.T + b1[None, :], 0.0) @ w2.T + b2[None, :]


if __name__ == "__main__":
    key = jax.random.PRNGKey(0)
    kx, kp, kx2 = jax.random.split(key, 3)

    hidden = 32   # num_neuronas_ocultas
    batch = 8     # N samples, each a single scalar feature

    x = jax.random.normal(kx, (batch, 1), jnp.float32)
    w1, b1, w2, b2 = init_params(kp, hidden)

    # jit the wrapper so the pack/pad/reshape plumbing fuses around the kernel.
    fwd = jax.jit(red_neuronal_forward)
    out = jax.block_until_ready(fwd(x, w1, b1, w2, b2))

    ref = _reference(x, w1, b1, w2, b2)
    assert out.shape == (batch, 1)
    assert jnp.allclose(out, ref, atol=1e-5, rtol=1e-5)

    # Second check: ragged batch spanning multiple (TR, 128) tiles / grid steps.
    n2 = 3089
    x2 = jax.random.normal(kx2, (n2, 1), jnp.float32)
    fwd2 = jax.jit(lambda *a: red_neuronal_forward(*a, max_rows_per_tile=8))
    out2 = jax.block_until_ready(fwd2(x2, w1, b1, w2, b2))
    ref2 = _reference(x2, w1, b1, w2, b2)
    assert out2.shape == (n2, 1)
    assert jnp.allclose(out2, ref2, atol=1e-5, rtol=1e-5)

    print("KERNEL_OK")
</pallas_src>

<mosaic_0001>
module attributes {stable_mosaic.version = 11 : i64} {
  func.func @kernel(%arg0: i32, %arg1: memref<97xf32, #tpu.memory_space<smem>>, %arg2: memref<8x128xf32, #tpu.memory_space<vmem>>, %arg3: memref<8x128xf32, #tpu.memory_space<vmem>>) attributes {dimension_semantics = [#tpu.dimension_semantics<parallel>], iteration_bounds = array<i64: 1>, scalar_prefetch = 0 : i64, scratch_operands = 0 : i64, tpu.core_type = #tpu.core_type<tc>, window_params = [{transform_indices = @transform_0, window_bounds = array<i64: 97>}, {transform_indices = @transform_1, window_bounds = array<i64: 8, 128>}, {transform_indices = @transform_2, window_bounds = array<i64: 8, 128>}]} {
    %c0 = arith.constant 0 : index
    %c0_0 = arith.constant 0 : index
    %0 = vector.load %arg2[%c0, %c0_0] : memref<8x128xf32, #tpu.memory_space<vmem>>, vector<8x128xf32>
    %cst = arith.constant 0.000000e+00 : f32
    %1 = vector.broadcast %cst : f32 to vector<8x128xf32>
    %c0_1 = arith.constant 0 : index
    %2 = memref.load %arg1[%c0_1] : memref<97xf32, #tpu.memory_space<smem>>
    %c32 = arith.constant 32 : index
    %3 = memref.load %arg1[%c32] : memref<97xf32, #tpu.memory_space<smem>>
    %c64 = arith.constant 64 : index
    %4 = memref.load %arg1[%c64] : memref<97xf32, #tpu.memory_space<smem>>
    %5 = vector.broadcast %2 : f32 to vector<8x128xf32>
    %6 = arith.mulf %5, %0 : vector<8x128xf32>
    %7 = vector.broadcast %3 : f32 to vector<8x128xf32>
    %8 = arith.addf %6, %7 : vector<8x128xf32>
    %cst_2 = arith.constant 0.000000e+00 : f32
    %9 = vector.broadcast %cst_2 : f32 to vector<8x128xf32>
    %10 = arith.maximumf %8, %9 : vector<8x128xf32>
    %11 = vector.broadcast %4 : f32 to vector<8x128xf32>
    %12 = arith.mulf %11, %10 : vector<8x128xf32>
    %13 = arith.addf %1, %12 : vector<8x128xf32>
    %c1 = arith.constant 1 : index
    %14 = memref.load %arg1[%c1] : memref<97xf32, #tpu.memory_space<smem>>
    %c33 = arith.constant 33 : index
    %15 = memref.load %arg1[%c33] : memref<97xf32, #tpu.memory_space<smem>>
    %c65 = arith.constant 65 : index
    %16 = memref.load %arg1[%c65] : memref<97xf32, #tpu.memory_space<smem>>
    %17 = vector.broadcast %14 : f32 to vector<8x128xf32>
    %18 = arith.mulf %17, %0 : vector<8x128xf32>
    %19 = vector.broadcast %15 : f32 to vector<8x128xf32>
    %20 = arith.addf %18, %19 : vector<8x128xf32>
    %cst_3 = arith.constant 0.000000e+00 : f32
    %21 = vector.broadcast %cst_3 : f32 to vector<8x128xf32>
    %22 = arith.maximumf %20, %21 : vector<8x128xf32>
    %23 = vector.broadcast %16 : f32 to vector<8x128xf32>
    %24 = arith.mulf %23, %22 : vector<8x128xf32>
    %25 = arith.addf %13, %24 : vector<8x128xf32>
    %c2 = arith.constant 2 : index
    %26 = memref.load %arg1[%c2] : memref<97xf32, #tpu.memory_space<smem>>
    %c34 = arith.constant 34 : index
    %27 = memref.load %arg1[%c34] : memref<97xf32, #tpu.memory_space<smem>>
    %c66 = arith.constant 66 : index
    %28 = memref.load %arg1[%c66] : memref<97xf32, #tpu.memory_space<smem>>
    %29 = vector.broadcast %26 : f32 to vector<8x128xf32>
    %30 = arith.mulf %29, %0 : vector<8x128xf32>
    %31 = vector.broadcast %27 : f32 to vector<8x128xf32>
    %32 = arith.addf %30, %31 : vector<8x128xf32>
    %cst_4 = arith.constant 0.000000e+00 : f32
    %33 = vector.broadcast %cst_4 : f32 to vector<8x128xf32>
    %34 = arith.maximumf %32, %33 : vector<8x128xf32>
    %35 = vector.broadcast %28 : f32 to vector<8x128xf32>
    %36 = arith.mulf %35, %34 : vector<8x128xf32>
    %37 = arith.addf %25, %36 : vector<8x128xf32>
    %c3 = arith.constant 3 : index
    %38 = memref.load %arg1[%c3] : memref<97xf32, #tpu.memory_space<smem>>
    %c35 = arith.constant 35 : index
    %39 = memref.load %arg1[%c35] : memref<97xf32, #tpu.memory_space<smem>>
    %c67 = arith.constant 67 : index
    %40 = memref.load %arg1[%c67] : memref<97xf32, #tpu.memory_space<smem>>
    %41 = vector.broadcast %38 : f32 to vector<8x128xf32>
    %42 = arith.mulf %41, %0 : vector<8x128xf32>
    %43 = vector.broadcast %39 : f32 to vector<8x128xf32>
    %44 = arith.addf %42, %43 : vector<8x128xf32>
    %cst_5 = arith.constant 0.000000e+00 : f32
    %45 = vector.broadcast %cst_5 : f32 to vector<8x128xf32>
    %46 = arith.maximumf %44, %45 : vector<8x128xf32>
    %47 = vector.broadcast %40 : f32 to vector<8x128xf32>
    %48 = arith.mulf %47, %46 : vector<8x128xf32>
    %49 = arith.addf %37, %48 : vector<8x128xf32>
    %c4 = arith.constant 4 : index
    %50 = memref.load %arg1[%c4] : memref<97xf32, #tpu.memory_space<smem>>
    %c36 = arith.constant 36 : index
    %51 = memref.load %arg1[%c36] : memref<97xf32, #tpu.memory_space<smem>>
    %c68 = arith.constant 68 : index
    %52 = memref.load %arg1[%c68] : memref<97xf32, #tpu.memory_space<smem>>
    %53 = vector.broadcast %50 : f32 to vector<8x128xf32>
    %54 = arith.mulf %53, %0 : vector<8x128xf32>
    %55 = vector.broadcast %51 : f32 to vector<8x128xf32>
    %56 = arith.addf %54, %55 : vector<8x128xf32>
    %cst_6 = arith.constant 0.000000e+00 : f32
    %57 = vector.broadcast %cst_6 : f32 to vector<8x128xf32>
    %58 = arith.maximumf %56, %57 : vector<8x128xf32>
    %59 = vector.broadcast %52 : f32 to vector<8x128xf32>
    %60 = arith.mulf %59, %58 : vector<8x128xf32>
    %61 = arith.addf %49, %60 : vector<8x128xf32>
    %c5 = arith.constant 5 : index
    %62 = memref.load %arg1[%c5] : memref<97xf32, #tpu.memory_space<smem>>
    %c37 = arith.constant 37 : index
    %63 = memref.load %arg1[%c37] : memref<97xf32, #tpu.memory_space<smem>>
    %c69 = arith.constant 69 : index
    %64 = memref.load %arg1[%c69] : memref<97xf32, #tpu.memory_space<smem>>
    %65 = vector.broadcast %62 : f32 to vector<8x128xf32>
    %66 = arith.mulf %65, %0 : vector<8x128xf32>
    %67 = vector.broadcast %63 : f32 to vector<8x128xf32>
    %68 = arith.addf %66, %67 : vector<8x128xf32>
    %cst_7 = arith.constant 0.000000e+00 : f32
    %69 = vector.broadcast %cst_7 : f32 to vector<8x128xf32>
    %70 = arith.maximumf %68, %69 : vector<8x128xf32>
    %71 = vector.broadcast %64 : f32 to vector<8x128xf32>
    %72 = arith.mulf %71, %70 : vector<8x128xf32>
    %73 = arith.addf %61, %72 : vector<8x128xf32>
    %c6 = arith.constant 6 : index
    %74 = memref.load %arg1[%c6] : memref<97xf32, #tpu.memory_space<smem>>
    %c38 = arith.constant 38 : index
    %75 = memref.load %arg1[%c38] : memref<97xf32, #tpu.memory_space<smem>>
    %c70 = arith.constant 70 : index
    %76 = memref.load %arg1[%c70] : memref<97xf32, #tpu.memory_space<smem>>
    %77 = vector.broadcast %74 : f32 to vector<8x128xf32>
    %78 = arith.mulf %77, %0 : vector<8x128xf32>
    %79 = vector.broadcast %75 : f32 to vector<8x128xf32>
    %80 = arith.addf %78, %79 : vector<8x128xf32>
    %cst_8 = arith.constant 0.000000e+00 : f32
    %81 = vector.broadcast %cst_8 : f32 to vector<8x128xf32>
    %82 = arith.maximumf %80, %81 : vector<8x128xf32>
    %83 = vector.broadcast %76 : f32 to vector<8x128xf32>
    %84 = arith.mulf %83, %82 : vector<8x128xf32>
    %85 = arith.addf %73, %84 : vector<8x128xf32>
    %c7 = arith.constant 7 : index
    %86 = memref.load %arg1[%c7] : memref<97xf32, #tpu.memory_space<smem>>
    %c39 = arith.constant 39 : index
    %87 = memref.load %arg1[%c39] : memref<97xf32, #tpu.memory_space<smem>>
    %c71 = arith.constant 71 : index
    %88 = memref.load %arg1[%c71] : memref<97xf32, #tpu.memory_space<smem>>
    %89 = vector.broadcast %86 : f32 to vector<8x128xf32>
    %90 = arith.mulf %89, %0 : vector<8x128xf32>
    %91 = vector.broadcast %87 : f32 to vector<8x128xf32>
    %92 = arith.addf %90, %91 : vector<8x128xf32>
    %cst_9 = arith.constant 0.000000e+00 : f32
    %93 = vector.broadcast %cst_9 : f32 to vector<8x128xf32>
    %94 = arith.maximumf %92, %93 : vector<8x128xf32>
    %95 = vector.broadcast %88 : f32 to vector<8x128xf32>
    %96 = arith.mulf %95, %94 : vector<8x128xf32>
    %97 = arith.addf %85, %96 : vector<8x128xf32>
    %c8 = arith.constant 8 : index
    %98 = memref.load %arg1[%c8] : memref<97xf32, #tpu.memory_space<smem>>
    %c40 = arith.constant 40 : index
    %99 = memref.load %arg1[%c40] : memref<97xf32, #tpu.memory_space<smem>>
    %c72 = arith.constant 72 : index
    %100 = memref.load %arg1[%c72] : memref<97xf32, #tpu.memory_space<smem>>
    %101 = vector.broadcast %98 : f32 to vector<8x128xf32>
    %102 = arith.mulf %101, %0 : vector<8x128xf32>
    %103 = vector.broadcast %99 : f32 to vector<8x128xf32>
    %104 = arith.addf %102, %103 : vector<8x128xf32>
    %cst_10 = arith.constant 0.000000e+00 : f32
    %105 = vector.broadcast %cst_10 : f32 to vector<8x128xf32>
    %106 = arith.maximumf %104, %105 : vector<8x128xf32>
    %107 = vector.broadcast %100 : f32 to vector<8x128xf32>
    %108 = arith.mulf %107, %106 : vector<8x128xf32>
    %109 = arith.addf %97, %108 : vector<8x128xf32>
    %c9 = arith.constant 9 : index
    %110 = memref.load %arg1[%c9] : memref<97xf32, #tpu.memory_space<smem>>
    %c41 = arith.constant 41 : index
    %111 = memref.load %arg1[%c41] : memref<97xf32, #tpu.memory_space<smem>>
    %c73 = arith.constant 73 : index
    %112 = memref.load %arg1[%c73] : memref<97xf32, #tpu.memory_space<smem>>
    %113 = vector.broadcast %110 : f32 to vector<8x128xf32>
    %114 = arith.mulf %113, %0 : vector<8x128xf32>
    %115 = vector.broadcast %111 : f32 to vector<8x128xf32>
    %116 = arith.addf %114, %115 : vector<8x128xf32>
    %cst_11 = arith.constant 0.000000e+00 : f32
    %117 = vector.broadcast %cst_11 : f32 to vector<8x128xf32>
    %118 = arith.maximumf %116, %117 : vector<8x128xf32>
    %119 = vector.broadcast %112 : f32 to vector<8x128xf32>
    %120 = arith.mulf %119, %118 : vector<8x128xf32>
    %121 = arith.addf %109, %120 : vector<8x128xf32>
    %c10 = arith.constant 10 : index
    %122 = memref.load %arg1[%c10] : memref<97xf32, #tpu.memory_space<smem>>
    %c42 = arith.constant 42 : index
    %123 = memref.load %arg1[%c42] : memref<97xf32, #tpu.memory_space<smem>>
    %c74 = arith.constant 74 : index
    %124 = memref.load %arg1[%c74] : memref<97xf32, #tpu.memory_space<smem>>
    %125 = vector.broadcast %122 : f32 to vector<8x128xf32>
    %126 = arith.mulf %125, %0 : vector<8x128xf32>
    %127 = vector.broadcast %123 : f32 to vector<8x128xf32>
    %128 = arith.addf %126, %127 : vector<8x128xf32>
    %cst_12 = arith.constant 0.000000e+00 : f32
    %129 = vector.broadcast %cst_12 : f32 to vector<8x128xf32>
    %130 = arith.maximumf %128, %129 : vector<8x128xf32>
    %131 = vector.broadcast %124 : f32 to vector<8x128xf32>
    %132 = arith.mulf %131, %130 : vector<8x128xf32>
    %133 = arith.addf %121, %132 : vector<8x128xf32>
    %c11 = arith.constant 11 : index
    %134 = memref.load %arg1[%c11] : memref<97xf32, #tpu.memory_space<smem>>
    %c43 = arith.constant 43 : index
    %135 = memref.load %arg1[%c43] : memref<97xf32, #tpu.memory_space<smem>>
    %c75 = arith.constant 75 : index
    %136 = memref.load %arg1[%c75] : memref<97xf32, #tpu.memory_space<smem>>
    %137 = vector.broadcast %134 : f32 to vector<8x128xf32>
    %138 = arith.mulf %137, %0 : vector<8x128xf32>
    %139 = vector.broadcast %135 : f32 to vector<8x128xf32>
    %140 = arith.addf %138, %139 : vector<8x128xf32>
    %cst_13 = arith.constant 0.000000e+00 : f32
    %141 = vector.broadcast %cst_13 : f32 to vector<8x128xf32>
    %142 = arith.maximumf %140, %141 : vector<8x128xf32>
    %143 = vector.broadcast %136 : f32 to vector<8x128xf32>
    %144 = arith.mulf %143, %142 : vector<8x128xf32>
    %145 = arith.addf %133, %144 : vector<8x128xf32>
    %c12 = arith.constant 12 : index
    %146 = memref.load %arg1[%c12] : memref<97xf32, #tpu.memory_space<smem>>
    %c44 = arith.constant 44 : index
    %147 = memref.load %arg1[%c44] : memref<97xf32, #tpu.memory_space<smem>>
    %c76 = arith.constant 76 : index
    %148 = memref.load %arg1[%c76] : memref<97xf32, #tpu.memory_space<smem>>
    %149 = vector.broadcast %146 : f32 to vector<8x128xf32>
    %150 = arith.mulf %149, %0 : vector<8x128xf32>
    %151 = vector.broadcast %147 : f32 to vector<8x128xf32>
    %152 = arith.addf %150, %151 : vector<8x128xf32>
    %cst_14 = arith.constant 0.000000e+00 : f32
    %153 = vector.broadcast %cst_14 : f32 to vector<8x128xf32>
    %154 = arith.maximumf %152, %153 : vector<8x128xf32>
    %155 = vector.broadcast %148 : f32 to vector<8x128xf32>
    %156 = arith.mulf %155, %154 : vector<8x128xf32>
    %157 = arith.addf %145, %156 : vector<8x128xf32>
    %c13 = arith.constant 13 : index
    %158 = memref.load %arg1[%c13] : memref<97xf32, #tpu.memory_space<smem>>
    %c45 = arith.constant 45 : index
    %159 = memref.load %arg1[%c45] : memref<97xf32, #tpu.memory_space<smem>>
    %c77 = arith.constant 77 : index
    %160 = memref.load %arg1[%c77] : memref<97xf32, #tpu.memory_space<smem>>
    %161 = vector.broadcast %158 : f32 to vector<8x128xf32>
    %162 = arith.mulf %161, %0 : vector<8x128xf32>
    %163 = vector.broadcast %159 : f32 to vector<8x128xf32>
    %164 = arith.addf %162, %163 : vector<8x128xf32>
    %cst_15 = arith.constant 0.000000e+00 : f32
    %165 = vector.broadcast %cst_15 : f32 to vector<8x128xf32>
    %166 = arith.maximumf %164, %165 : vector<8x128xf32>
    %167 = vector.broadcast %160 : f32 to vector<8x128xf32>
    %168 = arith.mulf %167, %166 : vector<8x128xf32>
    %169 = arith.addf %157, %168 : vector<8x128xf32>
    %c14 = arith.constant 14 : index
    %170 = memref.load %arg1[%c14] : memref<97xf32, #tpu.memory_space<smem>>
    %c46 = arith.constant 46 : index
    %171 = memref.load %arg1[%c46] : memref<97xf32, #tpu.memory_space<smem>>
    %c78 = arith.constant 78 : index
    %172 = memref.load %arg1[%c78] : memref<97xf32, #tpu.memory_space<smem>>
    %173 = vector.broadcast %170 : f32 to vector<8x128xf32>
    %174 = arith.mulf %173, %0 : vector<8x128xf32>
    %175 = vector.broadcast %171 : f32 to vector<8x128xf32>
    %176 = arith.addf %174, %175 : vector<8x128xf32>
    %cst_16 = arith.constant 0.000000e+00 : f32
    %177 = vector.broadcast %cst_16 : f32 to vector<8x128xf32>
    %178 = arith.maximumf %176, %177 : vector<8x128xf32>
    %179 = vector.broadcast %172 : f32 to vector<8x128xf32>
    %180 = arith.mulf %179, %178 : vector<8x128xf32>
    %181 = arith.addf %169, %180 : vector<8x128xf32>
    %c15 = arith.constant 15 : index
    %182 = memref.load %arg1[%c15] : memref<97xf32, #tpu.memory_space<smem>>
    %c47 = arith.constant 47 : index
    %183 = memref.load %arg1[%c47] : memref<97xf32, #tpu.memory_space<smem>>
    %c79 = arith.constant 79 : index
    %184 = memref.load %arg1[%c79] : memref<97xf32, #tpu.memory_space<smem>>
    %185 = vector.broadcast %182 : f32 to vector<8x128xf32>
    %186 = arith.mulf %185, %0 : vector<8x128xf32>
    %187 = vector.broadcast %183 : f32 to vector<8x128xf32>
    %188 = arith.addf %186, %187 : vector<8x128xf32>
    %cst_17 = arith.constant 0.000000e+00 : f32
    %189 = vector.broadcast %cst_17 : f32 to vector<8x128xf32>
    %190 = arith.maximumf %188, %189 : vector<8x128xf32>
    %191 = vector.broadcast %184 : f32 to vector<8x128xf32>
    %192 = arith.mulf %191, %190 : vector<8x128xf32>
    %193 = arith.addf %181, %192 : vector<8x128xf32>
    %c16 = arith.constant 16 : index
    %194 = memref.load %arg1[%c16] : memref<97xf32, #tpu.memory_space<smem>>
    %c48 = arith.constant 48 : index
    %195 = memref.load %arg1[%c48] : memref<97xf32, #tpu.memory_space<smem>>
    %c80 = arith.constant 80 : index
    %196 = memref.load %arg1[%c80] : memref<97xf32, #tpu.memory_space<smem>>
    %197 = vector.broadcast %194 : f32 to vector<8x128xf32>
    %198 = arith.mulf %197, %0 : vector<8x128xf32>
    %199 = vector.broadcast %195 : f32 to vector<8x128xf32>
    %200 = arith.addf %198, %199 : vector<8x128xf32>
    %cst_18 = arith.constant 0.000000e+00 : f32
    %201 = vector.broadcast %cst_18 : f32 to vector<8x128xf32>
    %202 = arith.maximumf %200, %201 : vector<8x128xf32>
    %203 = vector.broadcast %196 : f32 to vector<8x128xf32>
    %204 = arith.mulf %203, %202 : vector<8x128xf32>
    %205 = arith.addf %193, %204 : vector<8x128xf32>
    %c17 = arith.constant 17 : index
    %206 = memref.load %arg1[%c17] : memref<97xf32, #tpu.memory_space<smem>>
    %c49 = arith.constant 49 : index
    %207 = memref.load %arg1[%c49] : memref<97xf32, #tpu.memory_space<smem>>
    %c81 = arith.constant 81 : index
    %208 = memref.load %arg1[%c81] : memref<97xf32, #tpu.memory_space<smem>>
    %209 = vector.broadcast %206 : f32 to vector<8x128xf32>
    %210 = arith.mulf %209, %0 : vector<8x128xf32>
    %211 = vector.broadcast %207 : f32 to vector<8x128xf32>
    %212 = arith.addf %210, %211 : vector<8x128xf32>
    %cst_19 = arith.constant 0.000000e+00 : f32
    %213 = vector.broadcast %cst_19 : f32 to vector<8x128xf32>
    %214 = arith.maximumf %212, %213 : vector<8x128xf32>
    %215 = vector.broadcast %208 : f32 to vector<8x128xf32>
    %216 = arith.mulf %215, %214 : vector<8x128xf32>
    %217 = arith.addf %205, %216 : vector<8x128xf32>
    %c18 = arith.constant 18 : index
    %218 = memref.load %arg1[%c18] : memref<97xf32, #tpu.memory_space<smem>>
    %c50 = arith.constant 50 : index
    %219 = memref.load %arg1[%c50] : memref<97xf32, #tpu.memory_space<smem>>
    %c82 = arith.constant 82 : index
    %220 = memref.load %arg1[%c82] : memref<97xf32, #tpu.memory_space<smem>>
    %221 = vector.broadcast %218 : f32 to vector<8x128xf32>
    %222 = arith.mulf %221, %0 : vector<8x128xf32>
    %223 = vector.broadcast %219 : f32 to vector<8x128xf32>
    %224 = arith.addf %222, %223 : vector<8x128xf32>
    %cst_20 = arith.constant 0.000000e+00 : f32
    %225 = vector.broadcast %cst_20 : f32 to vector<8x128xf32>
    %226 = arith.maximumf %224, %225 : vector<8x128xf32>
    %227 = vector.broadcast %220 : f32 to vector<8x128xf32>
    %228 = arith.mulf %227, %226 : vector<8x128xf32>
    %229 = arith.addf %217, %228 : vector<8x128xf32>
    %c19 = arith.constant 19 : index
    %230 = memref.load %arg1[%c19] : memref<97xf32, #tpu.memory_space<smem>>
    %c51 = arith.constant 51 : index
    %231 = memref.load %arg1[%c51] : memref<97xf32, #tpu.memory_space<smem>>
    %c83 = arith.constant 83 : index
    %232 = memref.load %arg1[%c83] : memref<97xf32, #tpu.memory_space<smem>>
    %233 = vector.broadcast %230 : f32 to vector<8x128xf32>
    %234 = arith.mulf %233, %0 : vector<8x128xf32>
    %235 = vector.broadcast %231 : f32 to vector<8x128xf32>
    %236 = arith.addf %234, %235 : vector<8x128xf32>
    %cst_21 = arith.constant 0.000000e+00 : f32
    %237 = vector.broadcast %cst_21 : f32 to vector<8x128xf32>
    %238 = arith.maximumf %236, %237 : vector<8x128xf32>
    %239 = vector.broadcast %232 : f32 to vector<8x128xf32>
    %240 = arith.mulf %239, %238 : vector<8x128xf32>
    %241 = arith.addf %229, %240 : vector<8x128xf32>
    %c20 = arith.constant 20 : index
    %242 = memref.load %arg1[%c20] : memref<97xf32, #tpu.memory_space<smem>>
    %c52 = arith.constant 52 : index
    %243 = memref.load %arg1[%c52] : memref<97xf32, #tpu.memory_space<smem>>
    %c84 = arith.constant 84 : index
    %244 = memref.load %arg1[%c84] : memref<97xf32, #tpu.memory_space<smem>>
    %245 = vector.broadcast %242 : f32 to vector<8x128xf32>
    %246 = arith.mulf %245, %0 : vector<8x128xf32>
    %247 = vector.broadcast %243 : f32 to vector<8x128xf32>
    %248 = arith.addf %246, %247 : vector<8x128xf32>
    %cst_22 = arith.constant 0.000000e+00 : f32
    %249 = vector.broadcast %cst_22 : f32 to vector<8x128xf32>
    %250 = arith.maximumf %248, %249 : vector<8x128xf32>
    %251 = vector.broadcast %244 : f32 to vector<8x128xf32>
    %252 = arith.mulf %251, %250 : vector<8x128xf32>
    %253 = arith.addf %241, %252 : vector<8x128xf32>
    %c21 = arith.constant 21 : index
    %254 = memref.load %arg1[%c21] : memref<97xf32, #tpu.memory_space<smem>>
    %c53 = arith.constant 53 : index
    %255 = memref.load %arg1[%c53] : memref<97xf32, #tpu.memory_space<smem>>
    %c85 = arith.constant 85 : index
    %256 = memref.load %arg1[%c85] : memref<97xf32, #tpu.memory_space<smem>>
    %257 = vector.broadcast %254 : f32 to vector<8x128xf32>
    %258 = arith.mulf %257, %0 : vector<8x128xf32>
    %259 = vector.broadcast %255 : f32 to vector<8x128xf32>
    %260 = arith.addf %258, %259 : vector<8x128xf32>
    %cst_23 = arith.constant 0.000000e+00 : f32
    %261 = vector.broadcast %cst_23 : f32 to vector<8x128xf32>
    %262 = arith.maximumf %260, %261 : vector<8x128xf32>
    %263 = vector.broadcast %256 : f32 to vector<8x128xf32>
    %264 = arith.mulf %263, %262 : vector<8x128xf32>
    %265 = arith.addf %253, %264 : vector<8x128xf32>
    %c22 = arith.constant 22 : index
    %266 = memref.load %arg1[%c22] : memref<97xf32, #tpu.memory_space<smem>>
    %c54 = arith.constant 54 : index
    %267 = memref.load %arg1[%c54] : memref<97xf32, #tpu.memory_space<smem>>
    %c86 = arith.constant 86 : index
    %268 = memref.load %arg1[%c86] : memref<97xf32, #tpu.memory_space<smem>>
    %269 = vector.broadcast %266 : f32 to vector<8x128xf32>
    %270 = arith.mulf %269, %0 : vector<8x128xf32>
    %271 = vector.broadcast %267 : f32 to vector<8x128xf32>
    %272 = arith.addf %270, %271 : vector<8x128xf32>
    %cst_24 = arith.constant 0.000000e+00 : f32
    %273 = vector.broadcast %cst_24 : f32 to vector<8x128xf32>
    %274 = arith.maximumf %272, %273 : vector<8x128xf32>
    %275 = vector.broadcast %268 : f32 to vector<8x128xf32>
    %276 = arith.mulf %275, %274 : vector<8x128xf32>
    %277 = arith.addf %265, %276 : vector<8x128xf32>
    %c23 = arith.constant 23 : index
    %278 = memref.load %arg1[%c23] : memref<97xf32, #tpu.memory_space<smem>>
    %c55 = arith.constant 55 : index
    %279 = memref.load %arg1[%c55] : memref<97xf32, #tpu.memory_space<smem>>
    %c87 = arith.constant 87 : index
    %280 = memref.load %arg1[%c87] : memref<97xf32, #tpu.memory_space<smem>>
    %281 = vector.broadcast %278 : f32 to vector<8x128xf32>
    %282 = arith.mulf %281, %0 : vector<8x128xf32>
    %283 = vector.broadcast %279 : f32 to vector<8x128xf32>
    %284 = arith.addf %282, %283 : vector<8x128xf32>
    %cst_25 = arith.constant 0.000000e+00 : f32
    %285 = vector.broadcast %cst_25 : f32 to vector<8x128xf32>
    %286 = arith.maximumf %284, %285 : vector<8x128xf32>
    %287 = vector.broadcast %280 : f32 to vector<8x128xf32>
    %288 = arith.mulf %287, %286 : vector<8x128xf32>
    %289 = arith.addf %277, %288 : vector<8x128xf32>
    %c24 = arith.constant 24 : index
    %290 = memref.load %arg1[%c24] : memref<97xf32, #tpu.memory_space<smem>>
    %c56 = arith.constant 56 : index
    %291 = memref.load %arg1[%c56] : memref<97xf32, #tpu.memory_space<smem>>
    %c88 = arith.constant 88 : index
    %292 = memref.load %arg1[%c88] : memref<97xf32, #tpu.memory_space<smem>>
    %293 = vector.broadcast %290 : f32 to vector<8x128xf32>
    %294 = arith.mulf %293, %0 : vector<8x128xf32>
    %295 = vector.broadcast %291 : f32 to vector<8x128xf32>
    %296 = arith.addf %294, %295 : vector<8x128xf32>
    %cst_26 = arith.constant 0.000000e+00 : f32
    %297 = vector.broadcast %cst_26 : f32 to vector<8x128xf32>
    %298 = arith.maximumf %296, %297 : vector<8x128xf32>
    %299 = vector.broadcast %292 : f32 to vector<8x128xf32>
    %300 = arith.mulf %299, %298 : vector<8x128xf32>
    %301 = arith.addf %289, %300 : vector<8x128xf32>
    %c25 = arith.constant 25 : index
    %302 = memref.load %arg1[%c25] : memref<97xf32, #tpu.memory_space<smem>>
    %c57 = arith.constant 57 : index
    %303 = memref.load %arg1[%c57] : memref<97xf32, #tpu.memory_space<smem>>
    %c89 = arith.constant 89 : index
    %304 = memref.load %arg1[%c89] : memref<97xf32, #tpu.memory_space<smem>>
    %305 = vector.broadcast %302 : f32 to vector<8x128xf32>
    %306 = arith.mulf %305, %0 : vector<8x128xf32>
    %307 = vector.broadcast %303 : f32 to vector<8x128xf32>
    %308 = arith.addf %306, %307 : vector<8x128xf32>
    %cst_27 = arith.constant 0.000000e+00 : f32
    %309 = vector.broadcast %cst_27 : f32 to vector<8x128xf32>
    %310 = arith.maximumf %308, %309 : vector<8x128xf32>
    %311 = vector.broadcast %304 : f32 to vector<8x128xf32>
    %312 = arith.mulf %311, %310 : vector<8x128xf32>
    %313 = arith.addf %301, %312 : vector<8x128xf32>
    %c26 = arith.constant 26 : index
    %314 = memref.load %arg1[%c26] : memref<97xf32, #tpu.memory_space<smem>>
    %c58 = arith.constant 58 : index
    %315 = memref.load %arg1[%c58] : memref<97xf32, #tpu.memory_space<smem>>
    %c90 = arith.constant 90 : index
    %316 = memref.load %arg1[%c90] : memref<97xf32, #tpu.memory_space<smem>>
    %317 = vector.broadcast %314 : f32 to vector<8x128xf32>
    %318 = arith.mulf %317, %0 : vector<8x128xf32>
    %319 = vector.broadcast %315 : f32 to vector<8x128xf32>
    %320 = arith.addf %318, %319 : vector<8x128xf32>
    %cst_28 = arith.constant 0.000000e+00 : f32
    %321 = vector.broadcast %cst_28 : f32 to vector<8x128xf32>
    %322 = arith.maximumf %320, %321 : vector<8x128xf32>
    %323 = vector.broadcast %316 : f32 to vector<8x128xf32>
    %324 = arith.mulf %323, %322 : vector<8x128xf32>
    %325 = arith.addf %313, %324 : vector<8x128xf32>
    %c27 = arith.constant 27 : index
    %326 = memref.load %arg1[%c27] : memref<97xf32, #tpu.memory_space<smem>>
    %c59 = arith.constant 59 : index
    %327 = memref.load %arg1[%c59] : memref<97xf32, #tpu.memory_space<smem>>
    %c91 = arith.constant 91 : index
    %328 = memref.load %arg1[%c91] : memref<97xf32, #tpu.memory_space<smem>>
    %329 = vector.broadcast %326 : f32 to vector<8x128xf32>
    %330 = arith.mulf %329, %0 : vector<8x128xf32>
    %331 = vector.broadcast %327 : f32 to vector<8x128xf32>
    %332 = arith.addf %330, %331 : vector<8x128xf32>
    %cst_29 = arith.constant 0.000000e+00 : f32
    %333 = vector.broadcast %cst_29 : f32 to vector<8x128xf32>
    %334 = arith.maximumf %332, %333 : vector<8x128xf32>
    %335 = vector.broadcast %328 : f32 to vector<8x128xf32>
    %336 = arith.mulf %335, %334 : vector<8x128xf32>
    %337 = arith.addf %325, %336 : vector<8x128xf32>
    %c28 = arith.constant 28 : index
    %338 = memref.load %arg1[%c28] : memref<97xf32, #tpu.memory_space<smem>>
    %c60 = arith.constant 60 : index
    %339 = memref.load %arg1[%c60] : memref<97xf32, #tpu.memory_space<smem>>
    %c92 = arith.constant 92 : index
    %340 = memref.load %arg1[%c92] : memref<97xf32, #tpu.memory_space<smem>>
    %341 = vector.broadcast %338 : f32 to vector<8x128xf32>
    %342 = arith.mulf %341, %0 : vector<8x128xf32>
    %343 = vector.broadcast %339 : f32 to vector<8x128xf32>
    %344 = arith.addf %342, %343 : vector<8x128xf32>
    %cst_30 = arith.constant 0.000000e+00 : f32
    %345 = vector.broadcast %cst_30 : f32 to vector<8x128xf32>
    %346 = arith.maximumf %344, %345 : vector<8x128xf32>
    %347 = vector.broadcast %340 : f32 to vector<8x128xf32>
    %348 = arith.mulf %347, %346 : vector<8x128xf32>
    %349 = arith.addf %337, %348 : vector<8x128xf32>
    %c29 = arith.constant 29 : index
    %350 = memref.load %arg1[%c29] : memref<97xf32, #tpu.memory_space<smem>>
    %c61 = arith.constant 61 : index
    %351 = memref.load %arg1[%c61] : memref<97xf32, #tpu.memory_space<smem>>
    %c93 = arith.constant 93 : index
    %352 = memref.load %arg1[%c93] : memref<97xf32, #tpu.memory_space<smem>>
    %353 = vector.broadcast %350 : f32 to vector<8x128xf32>
    %354 = arith.mulf %353, %0 : vector<8x128xf32>
    %355 = vector.broadcast %351 : f32 to vector<8x128xf32>
    %356 = arith.addf %354, %355 : vector<8x128xf32>
    %cst_31 = arith.constant 0.000000e+00 : f32
    %357 = vector.broadcast %cst_31 : f32 to vector<8x128xf32>
    %358 = arith.maximumf %356, %357 : vector<8x128xf32>
    %359 = vector.broadcast %352 : f32 to vector<8x128xf32>
    %360 = arith.mulf %359, %358 : vector<8x128xf32>
    %361 = arith.addf %349, %360 : vector<8x128xf32>
    %c30 = arith.constant 30 : index
    %362 = memref.load %arg1[%c30] : memref<97xf32, #tpu.memory_space<smem>>
    %c62 = arith.constant 62 : index
    %363 = memref.load %arg1[%c62] : memref<97xf32, #tpu.memory_space<smem>>
    %c94 = arith.constant 94 : index
    %364 = memref.load %arg1[%c94] : memref<97xf32, #tpu.memory_space<smem>>
    %365 = vector.broadcast %362 : f32 to vector<8x128xf32>
    %366 = arith.mulf %365, %0 : vector<8x128xf32>
    %367 = vector.broadcast %363 : f32 to vector<8x128xf32>
    %368 = arith.addf %366, %367 : vector<8x128xf32>
    %cst_32 = arith.constant 0.000000e+00 : f32
    %369 = vector.broadcast %cst_32 : f32 to vector<8x128xf32>
    %370 = arith.maximumf %368, %369 : vector<8x128xf32>
    %371 = vector.broadcast %364 : f32 to vector<8x128xf32>
    %372 = arith.mulf %371, %370 : vector<8x128xf32>
    %373 = arith.addf %361, %372 : vector<8x128xf32>
    %c31 = arith.constant 31 : index
    %374 = memref.load %arg1[%c31] : memref<97xf32, #tpu.memory_space<smem>>
    %c63 = arith.constant 63 : index
    %375 = memref.load %arg1[%c63] : memref<97xf32, #tpu.memory_space<smem>>
    %c95 = arith.constant 95 : index
    %376 = memref.load %arg1[%c95] : memref<97xf32, #tpu.memory_space<smem>>
    %377 = vector.broadcast %374 : f32 to vector<8x128xf32>
    %378 = arith.mulf %377, %0 : vector<8x128xf32>
    %379 = vector.broadcast %375 : f32 to vector<8x128xf32>
    %380 = arith.addf %378, %379 : vector<8x128xf32>
    %cst_33 = arith.constant 0.000000e+00 : f32
    %381 = vector.broadcast %cst_33 : f32 to vector<8x128xf32>
    %382 = arith.maximumf %380, %381 : vector<8x128xf32>
    %383 = vector.broadcast %376 : f32 to vector<8x128xf32>
    %384 = arith.mulf %383, %382 : vector<8x128xf32>
    %385 = arith.addf %373, %384 : vector<8x128xf32>
    %c96 = arith.constant 96 : index
    %386 = memref.load %arg1[%c96] : memref<97xf32, #tpu.memory_space<smem>>
    %387 = vector.broadcast %386 : f32 to vector<8x128xf32>
    %388 = arith.addf %385, %387 : vector<8x128xf32>
    %c0_34 = arith.constant 0 : index
    %c0_35 = arith.constant 0 : index
    %389 = vector.load %arg3[%c0_34, %c0_35] : memref<8x128xf32, #tpu.memory_space<vmem>>, vector<8x128xf32>
    tpu.vector_store %arg3[%c0_34, %c0_35], %388 {strides = array<i32>} : memref<8x128xf32, #tpu.memory_space<vmem>>, vector<8x128xf32>,
    return
  }
  func.func @transform_0(%arg0: i32) -> i32 {
    %c0_i32 = arith.constant 0 : i32
    %c0_i32_0 = arith.constant 0 : i32
    return %c0_i32 : i32
  }
  func.func @transform_1(%arg0: i32) -> (i32, i32) {
    %c0_i32 = arith.constant 0 : i32
    %c0_i32_0 = arith.constant 0 : i32
    return %arg0, %c0_i32 : i32, i32
  }
  func.func @transform_2(%arg0: i32) -> (i32, i32) {
    %c0_i32 = arith.constant 0 : i32
    %c0_i32_0 = arith.constant 0 : i32
    return %arg0, %c0_i32 : i32, i32
  }
}

</mosaic_0001>

<bundles_post_ra>
// kernel: red_neuronal_forward.1
= control target key start
LH: loop header
LB: loop body
LE: loop exit
PB: predicated region body
PF: predicated region fallthrough
CT: control target
= control target key end

     0   :  { %7 = vsyncpa [#allocation3], 0  ;;  %s826_s0 = inlined_call_operand.vmem [shape: f32[97], index: 0, kind: input, shape index: {}]   ;;  %s827_s1 = inlined_call_operand.vmem [shape: f32[8,128], index: 1, kind: input, shape index: {}]   ;;  %s828_s2 = inlined_call_operand.vmem [shape: f32[8,128], index: 2, kind: output, shape index: {}]  }
   0x1   :  { %s14_s11 = sshll.u32 %s826_s0, 4  ;;  %s15_s11 = int_to_ptr.vmem [resolvable:$true] %s14_s11 }
   0x2   :  { %s483_s12 = scalar_lea.vmem %s15_s11, 16  ;;  %p488_p1 = scmp.lt.s32.totalorder %s15_s11, %s15_s11 }
   0x3   :  { %p484_p0 = scmp.ne.s32.totalorder %s15_s11, %s483_s12  ;;  %p489_p2 = scmp.lt.s32.totalorder %s483_s12, %s483_s12 }
   0x5   :  { %p490_p3 = por %p489_p2, %p488_p1 }
   0x7   :  { %p491_p4 = pnand %p490_p3, %p484_p0 }
   0x9   :  { %494 = shalt.err (!%p491_p4)
}
   0xa   :  { %s497_s13 = smov [#allocation2]  }
   0xb   :  { %17 = dma.vmem_to_smem %s15_s11, 16, %s497_s13, [#allocation3]  }
   0xc   :  { %495 = dma.done.wait [#allocation3], 16  }
   0xd   :  { %496 = vsyncadd [#allocation3], 4294967280 }
   0xe   :  { %23 = sfence }
   0xf   :  { %s25_s14 = sld [smem:[#allocation2]]  ;;  %s388_s17 = sld [smem:[#allocation2 + $0x1]]  ;;  %v525_v0 = vld [vmem:[%s827_s1] sm:$0xff] }
  0x10   :  { %s386_s15 = sld [smem:[#allocation2 + $0x20]]  ;;  %s389_s18 = sld [smem:[#allocation2 + $0x21]] }
  0x11   :  { %s516_s16 = sld [smem:[#allocation2 + $0x40]]  ;;  %s518_s0 = sld [smem:[#allocation2 + $0x41]] }
  0x12   :  { %s391_s19 = sld [smem:[#allocation2 + $0x2]]  ;;  %s394_s24 = sld [smem:[#allocation2 + $0x3]] }
  0x13   :  { %s520_s20 = sld [smem:[#allocation2 + $0x22]]  ;;  %s529_s25 = sld [smem:[#allocation2 + $0x23]] }
  0x14   :  { %s527_s23 = sld [smem:[#allocation2 + $0x42]]  ;;  %s531_s26 = sld [smem:[#allocation2 + $0x43]] }
  0x15   :  { %v28_v1 = vstv %s25_s14  ;;  %s533_s27 = sld [smem:[#allocation2 + $0x4]]  ;;  %v39_v4 = vstv %s388_s17  ;;  %s540_s29 = sld [smem:[#allocation2 + $0x5]] }
  0x16   :  { %v30_v2 = vstv %s386_s15  ;;  %s535_s28 = sld [smem:[#allocation2 + $0x24]]  ;;  %v29_v3 = vmul.f32 %v28_v1, %v525_v0  ;;  %v40_v5 = vmul.f32 %v39_v4, %v525_v0  ;;  %v41_v6 = vstv %s389_s18  ;;  %s543_s30 = sld [smem:[#allocation2 + $0x25]] }
  0x17   :  { %s538_s1 = sld [smem:[#allocation2 + $0x44]]  ;;  %v33_v8 = vstv %s516_s16  ;;  %s547_s3 = sld [smem:[#allocation2 + $0x6]]  ;;  %v44_v12 = vstv %s518_s0 }
  0x18   :  { %v31_v7 = vadd.f32 %v30_v2, %v29_v3  ;;  %v50_v9 = vstv %s391_s19  ;;  %s549_s4 = sld [smem:[#allocation2 + $0x26]]  ;;  %v42_v11 = vadd.f32 %v41_v6, %v40_v5  ;;  %v61_v14 = vstv %s394_s24  ;;  %s553_s5 = sld [smem:[#allocation2 + $0x45]] }
  0x19   :  { %v52_v10 = vstv %s520_s20  ;;  %v51_v13 = vmul.f32 %v50_v9, %v525_v0  ;;  %s555_s6 = sld [smem:[#allocation2 + $0x7]]  ;;  %v62_v17 = vmul.f32 %v61_v14, %v525_v0  ;;  %v63_v18 = vstv %s529_s25  ;;  %s560_s7 = sld [smem:[#allocation2 + $0x46]] }
  0x1a   :  { %v32_v15 = vmax.f32 %v31_v7, 0.0  ;;  %v55_v16 = vstv %s527_s23  ;;  %s562_s8 = sld [smem:[#allocation2 + $0x27]]  ;;  %v43_v19 = vmax.f32 %v42_v11, 0.0  ;;  %s566_s9 = sld [smem:[#allocation2 + $0x8]]  ;;  %v66_v25 = vstv %s531_s26 }
  0x1b   :  { %v53_v20 = vadd.f32 %v52_v10, %v51_v13  ;;  %v72_v21 = vstv %s533_s27  ;;  %s568_s10 = sld [smem:[#allocation2 + $0x28]]  ;;  %v64_v24 = vadd.f32 %v63_v18, %v62_v17  ;;  %s572_s11 = sld [smem:[#allocation2 + $0x47]]  ;;  %v83_v29 = vstv %s540_s29 }
  0x1c   :  { %v74_v22 = vstv %s535_s28  ;;  %v34_v23 = vmul.f32 %v33_v8, %v32_v15  ;;  %v73_v26 = vmul.f32 %v72_v21, %v525_v0  ;;  %v45_v27 = vmul.f32 %v44_v12, %v43_v19  ;;  %s576_s12 = sld [smem:[#allocation2 + $0x9]]  ;;  %s582_s14 = sld [smem:[#allocation2 + $0x48]] }
  0x1d   :  { %v54_v28 = vmax.f32 %v53_v20, 0.0  ;;  %v85_v30 = vstv %s543_s30  ;;  %s578_s13 = sld [smem:[#allocation2 + $0x29]]  ;;  %v65_v31 = vmax.f32 %v64_v24, 0.0  ;;  %v77_v33 = vstv %s538_s1  ;;  %s586_s15 = sld [smem:[#allocation2 + $0xa]] }
  0x1e   :  { %v75_v32 = vadd.f32 %v74_v22, %v73_v26  ;;  %v84_v34 = vmul.f32 %v83_v29, %v525_v0  ;;  %v46_v35 = vadd.f32 %v45_v27, %v34_v23  ;;  %v94_v37 = vstv %s547_s3  ;;  %s588_s16 = sld [smem:[#allocation2 + $0x2a]]  ;;  %s591_s17 = sld [smem:[#allocation2 + $0x49]] }
  0x1f   :  { %v56_v36 = vmul.f32 %v55_v16, %v54_v28  ;;  %v96_v38 = vstv %s549_s4  ;;  %v67_v39 = vmul.f32 %v66_v25, %v65_v31  ;;  %v95_v42 = vmul.f32 %v94_v37, %v525_v0  ;;  %s596_s18 = sld [smem:[#allocation2 + $0xb]]  ;;  %s601_s19 = sld [smem:[#allocation2 + $0x4a]] }
  0x20   :  { %v76_v40 = vmax.f32 %v75_v32, 0.0  ;;  %v86_v41 = vadd.f32 %v85_v30, %v84_v34  ;;  %v88_v44 = vstv %s553_s5  ;;  %v105_v45 = vstv %s555_s6  ;;  %s598_s0 = sld [smem:[#allocation2 + $0x2b]]  ;;  %s606_s20 = sld [smem:[#allocation2 + $0xc]] }
  0x21   :  { %v57_v43 = vadd.f32 %v56_v36, %v46_v35  ;;  %v107_v46 = vstv %s562_s8  ;;  %v97_v49 = vadd.f32 %v96_v38, %v95_v42  ;;  %v106_v50 = vmul.f32 %v105_v45, %v525_v0  ;;  %s608_s21 = sld [smem:[#allocation2 + $0x2c]]  ;;  %s611_s22 = sld [smem:[#allocation2 + $0x4b]] }
  0x22   :  { %v78_v47 = vmul.f32 %v77_v33, %v76_v40  ;;  %v87_v48 = vmax.f32 %v86_v41, 0.0  ;;  %v99_v52 = vstv %s560_s7  ;;  %v116_v53 = vstv %s566_s9  ;;  %s616_s23 = sld [smem:[#allocation2 + $0xd]]  ;;  %s621_s25 = sld [smem:[#allocation2 + $0x4c]] }
  0x23   :  { %v68_v51 = vadd.f32 %v67_v39, %v57_v43  ;;  %v118_v54 = vstv %s568_s10  ;;  %v98_v56 = vmax.f32 %v97_v49, 0.0  ;;  %v108_v57 = vadd.f32 %v107_v46, %v106_v50  ;;  %s618_s24 = sld [smem:[#allocation2 + $0x2d]]  ;;  %s626_s26 = sld [smem:[#allocation2 + $0xe]] }
  0x24   :  { %v89_v55 = vmul.f32 %v88_v44, %v87_v48  ;;  %v117_v58 = vmul.f32 %v116_v53, %v525_v0  ;;  %v110_v60 = vstv %s572_s11  ;;  %v127_v61 = vstv %s576_s12  ;;  %s628_s27 = sld [smem:[#allocation2 + $0x2e]]  ;;  %s631_s28 = sld [smem:[#allocation2 + $0x4d]] }
  0x25   :  { %v79_v59 = vadd.f32 %v78_v47, %v68_v51  ;;  %v129_v62 = vstv %s578_s13  ;;  %v100_v63 = vmul.f32 %v99_v52, %v98_v56  ;;  %v109_v1 = vmax.f32 %v108_v57, 0.0  ;;  %s636_s1 = sld [smem:[#allocation2 + $0xf]]  ;;  %s641_s30 = sld [smem:[#allocation2 + $0x4e]] }
  0x26   :  { %v119_v2 = vadd.f32 %v118_v54, %v117_v58  ;;  %v128_v3 = vmul.f32 %v127_v61, %v525_v0  ;;  %v121_v5 = vstv %s582_s14  ;;  %v138_v6 = vstv %s586_s15  ;;  %s638_s29 = sld [smem:[#allocation2 + $0x2f]]  ;;  %s646_s3 = sld [smem:[#allocation2 + $0x10]] }
  0x27   :  { %v90_v4 = vadd.f32 %v89_v55, %v79_v59  ;;  %v140_v7 = vstv %s588_s16  ;;  %v111_v8 = vmul.f32 %v110_v60, %v109_v1  ;;  %v139_v11 = vmul.f32 %v138_v6, %v525_v0  ;;  %s648_s4 = sld [smem:[#allocation2 + $0x30]]  ;;  %s651_s5 = sld [smem:[#allocation2 + $0x4f]] }
  0x28   :  { %v120_v9 = vmax.f32 %v119_v2, 0.0  ;;  %v130_v10 = vadd.f32 %v129_v62, %v128_v3  ;;  %v132_v13 = vstv %s591_s17  ;;  %v149_v14 = vstv %s596_s18  ;;  %s656_s6 = sld [smem:[#allocation2 + $0x11]]  ;;  %s661_s8 = sld [smem:[#allocation2 + $0x50]] }
  0x29   :  { %v101_v12 = vadd.f32 %v100_v63, %v90_v4  ;;  %v151_v15 = vstv %s598_s0  ;;  %v141_v18 = vadd.f32 %v140_v7, %v139_v11  ;;  %v150_v19 = vmul.f32 %v149_v14, %v525_v0  ;;  %s658_s7 = sld [smem:[#allocation2 + $0x31]]  ;;  %s666_s9 = sld [smem:[#allocation2 + $0x12]] }
  0x2a   :  { %v122_v16 = vmul.f32 %v121_v5, %v120_v9  ;;  %v131_v17 = vmax.f32 %v130_v10, 0.0  ;;  %v143_v21 = vstv %s601_s19  ;;  %v160_v22 = vstv %s606_s20  ;;  %s668_s10 = sld [smem:[#allocation2 + $0x32]]  ;;  %s671_s11 = sld [smem:[#allocation2 + $0x51]] }
  0x2b   :  { %v112_v20 = vadd.f32 %v111_v8, %v101_v12  ;;  %v162_v23 = vstv %s608_s21  ;;  %v142_v25 = vmax.f32 %v141_v18, 0.0  ;;  %v152_v26 = vadd.f32 %v151_v15, %v150_v19  ;;  %s676_s12 = sld [smem:[#allocation2 + $0x13]]  ;;  %s681_s14 = sld [smem:[#allocation2 + $0x52]] }
  0x2c   :  { %v133_v24 = vmul.f32 %v132_v13, %v131_v17  ;;  %v161_v27 = vmul.f32 %v160_v22, %v525_v0  ;;  %v154_v29 = vstv %s611_s22  ;;  %v171_v30 = vstv %s616_s23  ;;  %s678_s13 = sld [smem:[#allocation2 + $0x33]]  ;;  %s686_s15 = sld [smem:[#allocation2 + $0x14]] }
  0x2d   :  { %v123_v28 = vadd.f32 %v122_v16, %v112_v20  ;;  %v173_v31 = vstv %s618_s24  ;;  %v144_v32 = vmul.f32 %v143_v21, %v142_v25  ;;  %v153_v33 = vmax.f32 %v152_v26, 0.0  ;;  %s688_s16 = sld [smem:[#allocation2 + $0x34]]  ;;  %s691_s17 = sld [smem:[#allocation2 + $0x53]] }
  0x2e   :  { %v163_v34 = vadd.f32 %v162_v23, %v161_v27  ;;  %v172_v35 = vmul.f32 %v171_v30, %v525_v0  ;;  %v165_v37 = vstv %s621_s25  ;;  %v182_v38 = vstv %s626_s26  ;;  %s696_s18 = sld [smem:[#allocation2 + $0x15]]  ;;  %s701_s19 = sld [smem:[#allocation2 + $0x54]] }
  0x2f   :  { %v134_v36 = vadd.f32 %v133_v24, %v123_v28  ;;  %v184_v39 = vstv %s628_s27  ;;  %v155_v40 = vmul.f32 %v154_v29, %v153_v33  ;;  %v183_v43 = vmul.f32 %v182_v38, %v525_v0  ;;  %s698_s0 = sld [smem:[#allocation2 + $0x35]]  ;;  %s706_s20 = sld [smem:[#allocation2 + $0x16]] }
  0x30   :  { %v164_v41 = vmax.f32 %v163_v34, 0.0  ;;  %v174_v42 = vadd.f32 %v173_v31, %v172_v35  ;;  %v176_v45 = vstv %s631_s28  ;;  %v193_v46 = vstv %s636_s1  ;;  %s708_s21 = sld [smem:[#allocation2 + $0x36]]  ;;  %s711_s22 = sld [smem:[#allocation2 + $0x55]] }
  0x31   :  { %v145_v44 = vadd.f32 %v144_v32, %v134_v36  ;;  %v195_v47 = vstv %s638_s29  ;;  %v185_v50 = vadd.f32 %v184_v39, %v183_v43  ;;  %v194_v51 = vmul.f32 %v193_v46, %v525_v0  ;;  %s716_s23 = sld [smem:[#allocation2 + $0x17]]  ;;  %s721_s25 = sld [smem:[#allocation2 + $0x56]] }
  0x32   :  { %v166_v48 = vmul.f32 %v165_v37, %v164_v41  ;;  %v175_v49 = vmax.f32 %v174_v42, 0.0  ;;  %v187_v53 = vstv %s641_s30  ;;  %v204_v54 = vstv %s646_s3  ;;  %s718_s24 = sld [smem:[#allocation2 + $0x37]]  ;;  %s726_s26 = sld [smem:[#allocation2 + $0x18]] }
  0x33   :  { %v156_v52 = vadd.f32 %v155_v40, %v145_v44  ;;  %v206_v55 = vstv %s648_s4  ;;  %v186_v57 = vmax.f32 %v185_v50, 0.0  ;;  %v196_v58 = vadd.f32 %v195_v47, %v194_v51  ;;  %s728_s27 = sld [smem:[#allocation2 + $0x38]]  ;;  %s731_s28 = sld [smem:[#allocation2 + $0x57]] }
  0x34   :  { %v177_v56 = vmul.f32 %v176_v45, %v175_v49  ;;  %v205_v59 = vmul.f32 %v204_v54, %v525_v0  ;;  %v198_v61 = vstv %s651_s5  ;;  %v215_v62 = vstv %s656_s6  ;;  %s736_s1 = sld [smem:[#allocation2 + $0x19]]  ;;  %s741_s30 = sld [smem:[#allocation2 + $0x58]] }
  0x35   :  { %v167_v60 = vadd.f32 %v166_v48, %v156_v52  ;;  %v217_v63 = vstv %s658_s7  ;;  %v188_v1 = vmul.f32 %v187_v53, %v186_v57  ;;  %v197_v2 = vmax.f32 %v196_v58, 0.0  ;;  %s738_s29 = sld [smem:[#allocation2 + $0x39]]  ;;  %s746_s3 = sld [smem:[#allocation2 + $0x1a]] }
  0x36   :  { %v207_v3 = vadd.f32 %v206_v55, %v205_v59  ;;  %v216_v4 = vmul.f32 %v215_v62, %v525_v0  ;;  %v209_v6 = vstv %s661_s8  ;;  %v226_v7 = vstv %s666_s9  ;;  %s748_s4 = sld [smem:[#allocation2 + $0x3a]]  ;;  %s751_s5 = sld [smem:[#allocation2 + $0x59]] }
  0x37   :  { %v178_v5 = vadd.f32 %v177_v56, %v167_v60  ;;  %v228_v8 = vstv %s668_s10  ;;  %v199_v9 = vmul.f32 %v198_v61, %v197_v2  ;;  %v227_v12 = vmul.f32 %v226_v7, %v525_v0  ;;  %s756_s6 = sld [smem:[#allocation2 + $0x1b]]  ;;  %s761_s8 = sld [smem:[#allocation2 + $0x5a]] }
  0x38   :  { %v208_v10 = vmax.f32 %v207_v3, 0.0  ;;  %v218_v11 = vadd.f32 %v217_v63, %v216_v4  ;;  %v220_v14 = vstv %s671_s11  ;;  %v237_v15 = vstv %s676_s12  ;;  %s758_s7 = sld [smem:[#allocation2 + $0x3b]]  ;;  %s766_s9 = sld [smem:[#allocation2 + $0x1c]] }
  0x39   :  { %v189_v13 = vadd.f32 %v188_v1, %v178_v5  ;;  %v239_v16 = vstv %s678_s13  ;;  %v229_v19 = vadd.f32 %v228_v8, %v227_v12  ;;  %v238_v20 = vmul.f32 %v237_v15, %v525_v0  ;;  %s768_s10 = sld [smem:[#allocation2 + $0x3c]]  ;;  %s771_s11 = sld [smem:[#allocation2 + $0x5b]] }
  0x3a   :  { %v210_v17 = vmul.f32 %v209_v6, %v208_v10  ;;  %v219_v18 = vmax.f32 %v218_v11, 0.0  ;;  %v231_v22 = vstv %s681_s14  ;;  %v248_v23 = vstv %s686_s15  ;;  %s776_s12 = sld [smem:[#allocation2 + $0x1d]]  ;;  %s781_s14 = sld [smem:[#allocation2 + $0x5c]] }
  0x3b   :  { %v200_v21 = vadd.f32 %v199_v9, %v189_v13  ;;  %v250_v24 = vstv %s688_s16  ;;  %v230_v26 = vmax.f32 %v229_v19, 0.0  ;;  %v240_v27 = vadd.f32 %v239_v16, %v238_v20  ;;  %s778_s13 = sld [smem:[#allocation2 + $0x3d]]  ;;  %s786_s15 = sld [smem:[#allocation2 + $0x1e]] }
  0x3c   :  { %v221_v25 = vmul.f32 %v220_v14, %v219_v18  ;;  %v249_v28 = vmul.f32 %v248_v23, %v525_v0  ;;  %v242_v30 = vstv %s691_s17  ;;  %v259_v31 = vstv %s696_s18  ;;  %s788_s16 = sld [smem:[#allocation2 + $0x3e]]  ;;  %s791_s17 = sld [smem:[#allocation2 + $0x5d]] }
  0x3d   :  { %v211_v29 = vadd.f32 %v210_v17, %v200_v21  ;;  %v261_v32 = vstv %s698_s0  ;;  %v232_v33 = vmul.f32 %v231_v22, %v230_v26  ;;  %v241_v34 = vmax.f32 %v240_v27, 0.0  ;;  %s796_s18 = sld [smem:[#allocation2 + $0x1f]] }
  0x3e   :  { %v251_v35 = vadd.f32 %v250_v24, %v249_v28  ;;  %v260_v36 = vmul.f32 %v259_v31, %v525_v0  ;;  %v253_v38 = vstv %s701_s19  ;;  %v270_v39 = vstv %s706_s20  ;;  %s798_s0 = sld [smem:[#allocation2 + $0x3f]]  ;;  %s804_s19 = sld [smem:[#allocation2 + $0x5e]] }
  0x3f   :  { %v222_v37 = vadd.f32 %v221_v25, %v211_v29  ;;  %v272_v40 = vstv %s708_s21  ;;  %v243_v41 = vmul.f32 %v242_v30, %v241_v34  ;;  %v271_v44 = vmul.f32 %v270_v39, %v525_v0  ;;  %s810_s20 = sld [smem:[#allocation2 + $0x5f]]  ;;  %s481_s21 = sld [smem:[#allocation2 + $0x60]] }
  0x40   :  { %v252_v42 = vmax.f32 %v251_v35, 0.0  ;;  %v262_v43 = vadd.f32 %v261_v32, %v260_v36  ;;  %v264_v46 = vstv %s711_s22  ;;  %v281_v47 = vstv %s716_s23 }
  0x41   :  { %v233_v45 = vadd.f32 %v232_v33, %v222_v37  ;;  %v283_v48 = vstv %s718_s24  ;;  %v273_v51 = vadd.f32 %v272_v40, %v271_v44  ;;  %v282_v52 = vmul.f32 %v281_v47, %v525_v0 }
  0x42   :  { %v254_v49 = vmul.f32 %v253_v38, %v252_v42  ;;  %v263_v50 = vmax.f32 %v262_v43, 0.0  ;;  %v275_v54 = vstv %s721_s25  ;;  %v292_v55 = vstv %s726_s26 }
  0x43   :  { %v244_v53 = vadd.f32 %v243_v41, %v233_v45  ;;  %v294_v56 = vstv %s728_s27  ;;  %v274_v58 = vmax.f32 %v273_v51, 0.0  ;;  %v284_v59 = vadd.f32 %v283_v48, %v282_v52 }
  0x44   :  { %v265_v57 = vmul.f32 %v264_v46, %v263_v50  ;;  %v293_v60 = vmul.f32 %v292_v55, %v525_v0  ;;  %v286_v62 = vstv %s731_s28  ;;  %v303_v63 = vstv %s736_s1 }
  0x45   :  { %v255_v61 = vadd.f32 %v254_v49, %v244_v53  ;;  %v305_v1 = vstv %s738_s29  ;;  %v276_v2 = vmul.f32 %v275_v54, %v274_v58  ;;  %v285_v3 = vmax.f32 %v284_v59, 0.0 }
  0x46   :  { %v295_v4 = vadd.f32 %v294_v56, %v293_v60  ;;  %v304_v5 = vmul.f32 %v303_v63, %v525_v0  ;;  %v297_v7 = vstv %s741_s30  ;;  %v314_v8 = vstv %s746_s3 }
  0x47   :  { %v266_v6 = vadd.f32 %v265_v57, %v255_v61  ;;  %v316_v9 = vstv %s748_s4  ;;  %v287_v10 = vmul.f32 %v286_v62, %v285_v3  ;;  %v315_v13 = vmul.f32 %v314_v8, %v525_v0 }
  0x48   :  { %v296_v11 = vmax.f32 %v295_v4, 0.0  ;;  %v306_v12 = vadd.f32 %v305_v1, %v304_v5  ;;  %v308_v15 = vstv %s751_s5  ;;  %v325_v16 = vstv %s756_s6 }
  0x49   :  { %v277_v14 = vadd.f32 %v276_v2, %v266_v6  ;;  %v327_v17 = vstv %s758_s7  ;;  %v317_v20 = vadd.f32 %v316_v9, %v315_v13  ;;  %v326_v21 = vmul.f32 %v325_v16, %v525_v0 }
  0x4a   :  { %v298_v18 = vmul.f32 %v297_v7, %v296_v11  ;;  %v307_v19 = vmax.f32 %v306_v12, 0.0  ;;  %v319_v23 = vstv %s761_s8  ;;  %v336_v24 = vstv %s766_s9 }
  0x4b   :  { %v288_v22 = vadd.f32 %v287_v10, %v277_v14  ;;  %v338_v25 = vstv %s768_s10  ;;  %v318_v27 = vmax.f32 %v317_v20, 0.0  ;;  %v328_v28 = vadd.f32 %v327_v17, %v326_v21 }
  0x4c   :  { %v309_v26 = vmul.f32 %v308_v15, %v307_v19  ;;  %v337_v29 = vmul.f32 %v336_v24, %v525_v0  ;;  %v330_v31 = vstv %s771_s11  ;;  %v347_v32 = vstv %s776_s12 }
  0x4d   :  { %v299_v30 = vadd.f32 %v298_v18, %v288_v22  ;;  %v349_v33 = vstv %s778_s13  ;;  %v320_v34 = vmul.f32 %v319_v23, %v318_v27  ;;  %v329_v35 = vmax.f32 %v328_v28, 0.0 }
  0x4e   :  { %v339_v36 = vadd.f32 %v338_v25, %v337_v29  ;;  %v348_v37 = vmul.f32 %v347_v32, %v525_v0  ;;  %v341_v39 = vstv %s781_s14  ;;  %v358_v40 = vstv %s786_s15 }
  0x4f   :  { %v310_v38 = vadd.f32 %v309_v26, %v299_v30  ;;  %v360_v41 = vstv %s788_s16  ;;  %v331_v42 = vmul.f32 %v330_v31, %v329_v35  ;;  %v359_v45 = vmul.f32 %v358_v40, %v525_v0 }
  0x50   :  { %v340_v43 = vmax.f32 %v339_v36, 0.0  ;;  %v350_v44 = vadd.f32 %v349_v33, %v348_v37  ;;  %v352_v47 = vstv %s791_s17  ;;  %v369_v48 = vstv %s796_s18 }
  0x51   :  { %v321_v46 = vadd.f32 %v320_v34, %v310_v38  ;;  %v371_v49 = vstv %s798_s0  ;;  %v361_v52 = vadd.f32 %v360_v41, %v359_v45  ;;  %v370_v53 = vmul.f32 %v369_v48, %v525_v0 }
  0x52   :  { %v342_v50 = vmul.f32 %v341_v39, %v340_v43  ;;  %v351_v51 = vmax.f32 %v350_v44, 0.0  ;;  %v363_v55 = vstv %s804_s19  ;;  %v374_v60 = vstv %s810_s20 }
  0x53   :  { %v332_v54 = vadd.f32 %v331_v42, %v321_v46  ;;  %v362_v57 = vmax.f32 %v361_v52, 0.0  ;;  %v372_v58 = vadd.f32 %v371_v49, %v370_v53  ;;  %v378_v3 = vstv %s481_s21 }
  0x54   :  { %v353_v56 = vmul.f32 %v352_v47, %v351_v51 }
  0x55   :  { %v343_v59 = vadd.f32 %v342_v50, %v332_v54  ;;  %v364_v61 = vmul.f32 %v363_v55, %v362_v57  ;;  %v373_v62 = vmax.f32 %v372_v58, 0.0 }
  0x57   :  { %v354_v63 = vadd.f32 %v353_v56, %v343_v59  ;;  %v375_v1 = vmul.f32 %v374_v60, %v373_v62 }
  0x59   :  { %v365_v2 = vadd.f32 %v364_v61, %v354_v63 }
  0x5b   :  { %v376_v4 = vadd.f32 %v375_v1, %v365_v2 }
  0x5d   :  { %v379_v5 = vadd.f32 %v378_v3, %v376_v4 }
  0x5f   :  { %380 = vst [vmem:[%s828_s2] sm:$0xff] %v379_v5 }
  0x60   :  { %385 = vsyncpa [#allocation3], 1 }

</bundles_post_ra>
